<compile_context>
chip_gen: v7x
topology: tpu7x:2x2x1
jax: 0.10.0
libtpu: 0.0.40
codegen_flags: <defaults>
</compile_context>

<pallas_src>
import functools

import jax
import jax.numpy as jnp
from jax.experimental import pallas as pl
from jax.experimental.pallas import tpu as pltpu

LANES = 128
SUBLANES = 8
PAD_UNIT = SUBLANES * LANES        # 1024 elements = one (8, 128) f32 tile
MAX_BLOCK_ROWS = 8192              # 8192 * 128 * 4 B = 4 MiB per f32 input block
CHUNK_ROWS = 64                    # in-kernel streaming chunk (8 vregs / input)


def _huber_chunk_sum(pred_ref, tgt_ref, start, n_rows, delta):
    """Weighted-Huber sum over rows [start, start+n_rows) of the current block,
    folded to an (8, 128) f32 partial using only full-vreg VPU adds."""
    p = pred_ref[pl.ds(start, n_rows), :].astype(jnp.float32)
    t = tgt_ref[pl.ds(start, n_rows), :].astype(jnp.float32)
    w = jnp.sqrt(jnp.abs(t))
    # (p - t) * w == p*w - t*w up to f32 rounding order (PyTorch uses the latter).
    d = (p - t) * w
    ad = jnp.abs(d)
    # Branch-free Huber: c = min(|d|, delta); loss = c * (|d| - 0.5*c)
    c = jnp.minimum(ad, jnp.float32(delta))
    per = c * (ad - 0.5 * c)
    return per.reshape(-1, SUBLANES, LANES).sum(axis=0)


def _block_partial_sum(pred_ref, tgt_ref, n_rows, delta):
    """Sum rows [0, n_rows) of the current block (n_rows static, multiple of 8)."""
    acc = jnp.zeros((SUBLANES, LANES), jnp.float32)
    n_chunks = n_rows // CHUNK_ROWS
    rem_rows = n_rows % CHUNK_ROWS
    if n_chunks > 0:
        def body(k, a):
            row0 = pl.multiple_of(k * CHUNK_ROWS, CHUNK_ROWS)
            return a + _huber_chunk_sum(pred_ref, tgt_ref, row0, CHUNK_ROWS, delta)
        acc = jax.lax.fori_loop(0, n_chunks, body, acc, unroll=min(8, n_chunks))
    if rem_rows > 0:
        acc = acc + _huber_chunk_sum(pred_ref, tgt_ref, n_chunks * CHUNK_ROWS,
                                     rem_rows, delta)
    return acc


def _weighted_huber_kernel(pred_ref, tgt_ref, out_ref, *, delta, block_rows,
                           num_full_blocks, rem_block_rows):
    """Each grid step writes its own (8, 128) partial-sum block (parallel grid)."""
    if rem_block_rows == 0:
        out_ref[...] = _block_partial_sum(pred_ref, tgt_ref, block_rows, delta)
    else:
        i = pl.program_id(0)

        @pl.when(i < num_full_blocks)
        def _():
            out_ref[...] = _block_partial_sum(pred_ref, tgt_ref, block_rows, delta)

        @pl.when(i == num_full_blocks)
        def _():
            out_ref[...] = _block_partial_sum(pred_ref, tgt_ref, rem_block_rows,
                                              delta)


def _weighted_huber_sum_small(p, t, delta):
    """Plain-jnp weighted-Huber *sum* for tiny ragged tails (< 1024 elements)."""
    p = p.astype(jnp.float32)
    t = t.astype(jnp.float32)
    w = jnp.sqrt(jnp.abs(t))
    d = p * w - t * w
    ad = jnp.abs(d)
    c = jnp.minimum(ad, jnp.float32(delta))
    return jnp.sum(c * (ad - 0.5 * c))


def weighted_huber_loss(pred, target, delta=1.0, *, max_block_rows=MAX_BLOCK_ROWS):
    """Pallas implementation of WeightedHuberLoss.forward (mean reduction)."""
    assert pred.shape == target.shape, "pred/target must have identical shapes"
    n = pred.size
    assert n > 0
    assert max_block_rows % SUBLANES == 0
    delta = float(delta)

    p_flat = pred.reshape(-1)
    t_flat = target.reshape(-1)

    aligned = (n // PAD_UNIT) * PAD_UNIT

    if aligned < n:
        # Ragged tail (< 1024 elems): tiny jnp reduction in the wrapper instead
        # of padding/copying the whole array and masking in the kernel.
        tail_sum = _weighted_huber_sum_small(p_flat[aligned:], t_flat[aligned:],
                                             delta)
    else:
        tail_sum = jnp.float32(0.0)

    if aligned == 0:
        # Input smaller than one (8, 128) tile: not worth a kernel launch.
        return tail_sum / jnp.float32(n)

    rows = aligned // LANES                       # always a multiple of 8
    if aligned == n:
        p2 = p_flat.reshape(rows, LANES)          # contiguous view, no copy
        t2 = t_flat.reshape(rows, LANES)
    else:
        p2 = p_flat[:aligned].reshape(rows, LANES)
        t2 = t_flat[:aligned].reshape(rows, LANES)

    block_rows = min(rows, max_block_rows)        # multiple of 8
    num_full_blocks = rows // block_rows
    rem_block_rows = rows % block_rows            # multiple of 8 (maybe 0)
    grid_len = num_full_blocks + (1 if rem_block_rows else 0)

    kernel = functools.partial(
        _weighted_huber_kernel,
        delta=delta,
        block_rows=block_rows,
        num_full_blocks=num_full_blocks,
        rem_block_rows=rem_block_rows,
    )

    partials = pl.pallas_call(
        kernel,
        out_shape=jax.ShapeDtypeStruct((grid_len * SUBLANES, LANES), jnp.float32),
        grid_spec=pltpu.PrefetchScalarGridSpec(
            num_scalar_prefetch=0,
            grid=(grid_len,),
            in_specs=[
                pl.BlockSpec((block_rows, LANES), lambda i: (i, 0)),
                pl.BlockSpec((block_rows, LANES), lambda i: (i, 0)),
            ],
            out_specs=pl.BlockSpec((SUBLANES, LANES), lambda i: (i, 0)),
        ),
        compiler_params=pltpu.CompilerParams(
            dimension_semantics=("parallel",),      # shards across TCs on v7x
            vmem_limit_bytes=32 << 20,
        ),
    )(p2, t2)

    return (jnp.sum(partials) + tail_sum) / jnp.float32(n)


def _reference(pred, target, delta=1.0):
    """Pure-JAX mirror of the PyTorch module (for validation)."""
    w = jnp.sqrt(jnp.abs(target.astype(jnp.float32)))
    x = pred.astype(jnp.float32) * w
    y = target.astype(jnp.float32) * w
    d = x - y
    ad = jnp.abs(d)
    per = jnp.where(ad < delta, 0.5 * d * d, delta * (ad - 0.5 * delta))
    return jnp.mean(per)


if __name__ == "__main__":
    key = jax.random.PRNGKey(0)
    k1, k2, k3, k4 = jax.random.split(key, 4)

    # NCHW-style small shape: batch=2, channels=4, spatial 16x16 (2048 elems,
    # aligned single-block kernel path).
    pred = jax.random.normal(k1, (2, 4, 16, 16), dtype=jnp.float32) * 2.0
    target = jax.random.normal(k2, (2, 4, 16, 16), dtype=jnp.float32) * 2.0
    loss = jax.block_until_ready(weighted_huber_loss(pred, target, delta=1.0))
    ref = _reference(pred, target, delta=1.0)
    assert jnp.allclose(loss, ref, rtol=1e-5, atol=1e-6), (loss, ref)

    # Ragged shape: exercises the wrapper-side tail reduction.
    pred_r = jax.random.normal(k3, (3, 5, 17, 19), dtype=jnp.float32)
    target_r = jax.random.normal(k4, (3, 5, 17, 19), dtype=jnp.float32)
    loss_r = jax.block_until_ready(weighted_huber_loss(pred_r, target_r, 1.0))
    ref_r = _reference(pred_r, target_r, 1.0)
    assert jnp.allclose(loss_r, ref_r, rtol=1e-5, atol=1e-6), (loss_r, ref_r)

    # Multi-block + partial final block path (tiny max_block_rows override):
    # 3072 elems -> 24 rows -> blocks of 16 rows -> 1 full + 1 partial block.
    pred_m = jax.random.normal(k1, (3, 1, 32, 32), dtype=jnp.float32)
    target_m = jax.random.normal(k2, (3, 1, 32, 32), dtype=jnp.float32)
    loss_m = jax.block_until_ready(
        weighted_huber_loss(pred_m, target_m, 1.0, max_block_rows=16))
    ref_m = _reference(pred_m, target_m, 1.0)
    assert jnp.allclose(loss_m, ref_m, rtol=1e-5, atol=1e-6), (loss_m, ref_m)

    print("KERNEL_OK")
</pallas_src>

<mosaic_0001>
module attributes {stable_mosaic.version = 11 : i64} {
  func.func @_weighted_huber_kernel(%arg0: i32, %arg1: memref<16x128xf32, #tpu.memory_space<vmem>>, %arg2: memref<16x128xf32, #tpu.memory_space<vmem>>, %arg3: memref<8x128xf32, #tpu.memory_space<vmem>>) attributes {dimension_semantics = [#tpu.dimension_semantics<parallel>], iteration_bounds = array<i64: 1>, scalar_prefetch = 0 : i64, scratch_operands = 0 : i64, tpu.core_type = #tpu.core_type<tc>, window_params = [{transform_indices = @transform_0, window_bounds = array<i64: 16, 128>}, {transform_indices = @transform_1, window_bounds = array<i64: 16, 128>}, {transform_indices = @transform_2, window_bounds = array<i64: 8, 128>}]} {
    %cst = arith.constant 0.000000e+00 : f32
    %0 = vector.broadcast %cst : f32 to vector<8x128xf32>
    %c0 = arith.constant 0 : index
    %c0_0 = arith.constant 0 : index
    %1 = vector.load %arg1[%c0, %c0_0] : memref<16x128xf32, #tpu.memory_space<vmem>>, vector<16x128xf32>
    %c0_1 = arith.constant 0 : index
    %c0_2 = arith.constant 0 : index
    %2 = vector.load %arg2[%c0_1, %c0_2] : memref<16x128xf32, #tpu.memory_space<vmem>>, vector<16x128xf32>
    %3 = math.absf %2 : vector<16x128xf32>
    %4 = math.sqrt %3 : vector<16x128xf32>
    %5 = arith.subf %1, %2 : vector<16x128xf32>
    %6 = arith.mulf %5, %4 : vector<16x128xf32>
    %7 = math.absf %6 : vector<16x128xf32>
    %cst_3 = arith.constant 1.000000e+00 : f32
    %8 = vector.broadcast %cst_3 : f32 to vector<16x128xf32>
    %9 = arith.minimumf %7, %8 : vector<16x128xf32>
    %cst_4 = arith.constant 5.000000e-01 : f32
    %10 = vector.broadcast %cst_4 : f32 to vector<16x128xf32>
    %11 = arith.mulf %10, %9 : vector<16x128xf32>
    %12 = arith.subf %7, %11 : vector<16x128xf32>
    %13 = arith.mulf %9, %12 : vector<16x128xf32>
    %14 = vector.shape_cast %13 : vector<16x128xf32> to vector<2x8x128xf32>
    %cst_5 = arith.constant dense<0.000000e+00> : vector<8x128xf32>
    %15 = vector.multi_reduction <add>, %14, %cst_5 [0] : vector<2x8x128xf32> to vector<8x128xf32>
    %16 = arith.addf %0, %15 : vector<8x128xf32>
    %c0_6 = arith.constant 0 : index
    %c0_7 = arith.constant 0 : index
    %17 = vector.load %arg3[%c0_6, %c0_7] : memref<8x128xf32, #tpu.memory_space<vmem>>, vector<8x128xf32>
    tpu.vector_store %arg3[%c0_6, %c0_7], %16 {strides = array<i32>} : memref<8x128xf32, #tpu.memory_space<vmem>>, vector<8x128xf32>,
    return
  }
  func.func @transform_0(%arg0: i32) -> (i32, i32) {
    %c0_i32 = arith.constant 0 : i32
    %c0_i32_0 = arith.constant 0 : i32
    return %arg0, %c0_i32 : i32, i32
  }
  func.func @transform_1(%arg0: i32) -> (i32, i32) {
    %c0_i32 = arith.constant 0 : i32
    %c0_i32_0 = arith.constant 0 : i32
    return %arg0, %c0_i32 : i32, i32
  }
  func.func @transform_2(%arg0: i32) -> (i32, i32) {
    %c0_i32 = arith.constant 0 : i32
    %c0_i32_0 = arith.constant 0 : i32
    return %arg0, %c0_i32 : i32, i32
  }
}

</mosaic_0001>

<bundles_post_ra>
// kernel: tpu_custom_call.1
= control target key start
LH: loop header
LB: loop body
LE: loop exit
PB: predicated region body
PF: predicated region fallthrough
CT: control target
= control target key end

     0   :  { %7 = vsyncpa [#allocation3], 0  ;;  %s230_s0 = inlined_call_operand.hbm [shape: f32[16,128], index: 0, kind: input, shape index: {}]   ;;  %s231_s1 = inlined_call_operand.hbm [shape: f32[16,128], index: 1, kind: input, shape index: {}]   ;;  %s232_s2 = inlined_call_operand.hbm [shape: f32[8,128], index: 2, kind: output, shape index: {}]  }
   0x1   :  { %8 = vsyncpa [#allocation6], 0 }
   0x2   :  { %9 = vsyncpa [#allocation4], 0  ;;  %s174_s9 = smov [#allocation2]   ;;  %s102_s13 = scalar_lea.hbm %s230_s0, 256 }
   0x3   :  { %s15_s10 = sshll.u32 %s174_s9, 4  ;;  %p103_p0 = scmp.ne.s32.totalorder %s230_s0, %s102_s13  ;;  %s16_s10 = int_to_ptr.vmem [resolvable:$true] %s15_s10 }
   0x4   :  { %p106_p1 = scmp.lt.u32.totalorder %s102_s13, %s230_s0 }
   0x6   :  { %p108_p2 = pnand %p106_p1, %p103_p0 }
   0x8   :  { %111 = shalt.err (!%p108_p2)
}
   0x9   :  { %s112_s18 = scalar_lea.vmem %s16_s10, 256  ;;  %p117_p4 = scmp.lt.s32.totalorder %s16_s10, %s16_s10 }
   0xa   :  { %p113_p3 = scmp.ne.s32.totalorder %s16_s10, %s112_s18  ;;  %p118_p5 = scmp.lt.s32.totalorder %s112_s18, %s112_s18 }
   0xc   :  { %p119_p6 = por %p118_p5, %p117_p4 }
   0xe   :  { %p120_p7 = pnand %p119_p6, %p113_p3 }
  0x10   :  { %123 = shalt.err (!%p120_p7)
}
  0x11   :  { %s175_s19 = smov 128   ;;  %s176_s20 = smov 8  }
  0x12   :  { %21 = dma.hbm_to_vmem [thread:$0]  %s230_s0, 256, %s16_s10, [#allocation3], %s175_s19, %s175_s19, %s176_s20  }
  0x13   :  { %s177_s23 = smov [#allocation5]   ;;  %s124_s27 = scalar_lea.hbm %s231_s1, 256 }
  0x14   :  { %s27_s24 = sshll.u32 %s177_s23, 4  ;;  %p125_p8 = scmp.ne.s32.totalorder %s231_s1, %s124_s27  ;;  %s28_s24 = int_to_ptr.vmem [resolvable:$true] %s27_s24 }
  0x15   :  { %p128_p9 = scmp.lt.u32.totalorder %s124_s27, %s231_s1 }
  0x17   :  { %p130_p10 = pnand %p128_p9, %p125_p8 }
  0x19   :  { %133 = shalt.err (!%p130_p10)
}
  0x1a   :  { %s134_s4 = scalar_lea.vmem %s28_s24, 256  ;;  %p139_p12 = scmp.lt.s32.totalorder %s28_s24, %s28_s24 }
  0x1b   :  { %p135_p11 = scmp.ne.s32.totalorder %s28_s24, %s134_s4  ;;  %p140_p13 = scmp.lt.s32.totalorder %s134_s4, %s134_s4 }
  0x1d   :  { %p141_p0 = por %p140_p13, %p139_p12 }
  0x1f   :  { %p142_p1 = pnand %p141_p0, %p135_p11 }
  0x21   :  { %145 = shalt.err (!%p142_p1)
}
  0x22   :  { %33 = dma.hbm_to_vmem [thread:$0]  %s231_s1, 256, %s28_s24, [#allocation6], %s175_s19, %s175_s19, %s176_s20  }
  0x23   :  { %168 = dma.done.wait [#allocation3], 256  }
  0x24   :  { %169 = vsyncadd [#allocation3], 4294967040 }
  0x25   :  { %170 = dma.done.wait [#allocation6], 256  }
  0x26   :  { %171 = vsyncadd [#allocation6], 4294967040  ;;  %v42_v0 = vld [vmem:[#allocation5] sm:$0xff]  ;;  %v43_v1 = vld [vmem:[#allocation5 + $0x8] sm:$0xff]  ;;  %s178_s1 = smov [#allocation7]  }
  0x27   :  { %v44_v2 = vand.u32 2147483647, %v42_v0  ;;  %v45_v3 = vand.u32 2147483647, %v43_v1  ;;  %v40_v4 = vld [vmem:[#allocation2] sm:$0xff]  ;;  %v41_v5 = vld [vmem:[#allocation2 + $0x8] sm:$0xff] }
  0x28   :  { %v60_v8 = vsub.f32 %v40_v4, %v42_v0  ;;  %v61_v13 = vsub.f32 %v41_v5, %v43_v1  ;;  %s83_s6 = sshll.u32 %s178_s1, 4  ;;  %s84_s6 = int_to_ptr.vmem [resolvable:$true] %s83_s6 }
  0x29   :  { %98 = vrsqrt.f32 %v44_v2  ;;  %vm48_vm0 = vcmp.eq.f32.partialorder %v44_v2, inf  ;;  %v51_v7 = vand.u32 2147483648, %v44_v2  ;;  %vm50_vm1 = vcmp.eq.f32.partialorder %v44_v2, 0.0  ;;  %s146_s7 = scalar_lea.vmem %s84_s6, 128  ;;  %p151_p3 = scmp.lt.s32.totalorder %s84_s6, %s84_s6 }
  0x2a   :  { %100 = vrsqrt.f32 %v45_v3  ;;  %vm55_vm2 = vcmp.eq.f32.partialorder %v45_v3, inf  ;;  %v58_v11 = vand.u32 2147483648, %v45_v3  ;;  %vm57_vm3 = vcmp.eq.f32.partialorder %v45_v3, 0.0  ;;  %p147_p2 = scmp.ne.s32.totalorder %s84_s6, %s146_s7  ;;  %p152_p4 = scmp.lt.s32.totalorder %s146_s7, %s146_s7 }
  0x2c   :  { %p153_p5 = por %p152_p4, %p151_p3 }
  0x2e   :  { %p154_p6 = pnand %p153_p5, %p147_p2 }
  0x33   :  { %v99_v6 = vpop.eup %98 }
  0x34   :  { %v101_v9 = vpop.eup %100  ;;  %v47_v10 = vmul.f32 %v99_v6, %v44_v2 }
  0x35   :  { %v54_v12 = vmul.f32 %v101_v9, %v45_v3 }
  0x36   :  { %v49_v14 = vsel %vm48_vm0, %v44_v2, %v47_v10 }
  0x37   :  { %v52_v15 = vsel %vm50_vm1, %v51_v7, %v49_v14  ;;  %v56_v16 = vsel %vm55_vm2, %v45_v3, %v54_v12 }
  0x38   :  { %v59_v17 = vsel %vm57_vm3, %v58_v11, %v56_v16  ;;  %v62_v18 = vmul.f32 %v60_v8, %v52_v15 }
  0x39   :  { %v63_v19 = vmul.f32 %v61_v13, %v59_v17 }
  0x3a   :  { %v64_v20 = vand.u32 2147483647, %v62_v18 }
  0x3b   :  { %v65_v21 = vand.u32 2147483647, %v63_v19 }
  0x3c   :  { %v66_v22 = vmin.f32 %v64_v20, 1.0 }
  0x3d   :  { %v67_v23 = vmin.f32 %v65_v21, 1.0 }
  0x3e   :  { %v68_v24 = vmul.f32 0.5, %v66_v22 }
  0x3f   :  { %v69_v25 = vmul.f32 0.5, %v67_v23 }
  0x40   :  { %v70_v26 = vsub.f32 %v64_v20, %v68_v24 }
  0x41   :  { %v71_v27 = vsub.f32 %v65_v21, %v69_v25 }
  0x42   :  { %v72_v28 = vmul.f32 %v70_v26, %v66_v22 }
  0x43   :  { %v73_v29 = vmul.f32 %v71_v27, %v67_v23 }
  0x45   :  { %v74_v30 = vadd.f32 %v73_v29, %v72_v28 }
  0x47   :  { %76 = vst [vmem:[#allocation7] sm:$0xff] %v74_v30 }
  0x48   :  { %157 = shalt.err (!%p154_p6)
}
  0x49   :  { %s158_s10 = scalar_lea.hbm %s232_s2, 128 }
  0x4a   :  { %p159_p7 = scmp.ne.s32.totalorder %s232_s2, %s158_s10  ;;  %p162_p8 = scmp.lt.u32.totalorder %s158_s10, %s232_s2 }
  0x4c   :  { %p164_p9 = pnand %p162_p8, %p159_p7 }
  0x4e   :  { %167 = shalt.err (!%p164_p9)
}
  0x4f   :  { %86 = dma.vmem_to_hbm [thread:$0]  %s84_s6, 128, %s232_s2, [#allocation4]  }
  0x50   :  { %172 = dma.done.wait [#allocation4], 128  }
  0x51   :  { %173 = vsyncadd [#allocation4], 4294967168 }
  0x52   :  { %90 = vsyncpa [#allocation3], 1 }
  0x53   :  { %91 = vsyncpa [#allocation6], 1 }
  0x54   :  { %92 = vsyncpa [#allocation4], 1 }

</bundles_post_ra>
